<compile_context>
chip_gen: v7x
topology: tpu7x:2x2x1
jax: 0.10.0
libtpu: 0.0.40
codegen_flags: <defaults>
</compile_context>

<pallas_src>
import jax
import jax.numpy as jnp
from jax.experimental import pallas as pl
from jax.experimental.pallas import tpu as pltpu


NC_PAD = 128  # lane-dense padded width of the fc output


def _round_up(x, m):
    return (x + m - 1) // m * m


# ---------------------------------------------------------------------------
# Backbone stand-in: GAP + Linear + ReLU folded into one large-K MXU matmul.
# TODO(synk): the original module eval()'s an arbitrary pretrained CNN string;
#             a synthetic deterministic backbone is used here instead.
# ---------------------------------------------------------------------------
def backbone_kernel(x_ref, w_ref, b_ref, o_ref):
    """x_ref: (T, C*H*W) f32 tile; w_ref: (C*H*W, D) bf16 (GAP folded); b_ref: (1, D) f32."""
    x = x_ref[...].astype(jnp.bfloat16)
    feat = jnp.dot(x, w_ref[...], preferred_element_type=jnp.float32) + b_ref[...]
    o_ref[...] = jnp.maximum(feat, 0.0)


def _pick_tile_rows(rows, chw, d, budget_bytes=24 * 1024 * 1024):
    # Double-buffered (input tile + output tile) working set sized for the
    # smallest budget (v7x: 64 MiB physical / 32 MiB scoped VMEM).
    per_row = 2 * (chw * 4 + d * 4)
    t = max(8, min(512, budget_bytes // max(per_row, 1)))
    t = (t // 8) * 8
    return min(t, _round_up(rows, 8))


def run_backbone(x2, w_gap_bf16, b_bb):
    rows, chw = x2.shape
    d = w_gap_bf16.shape[1]
    tile = _pick_tile_rows(rows, chw, d)
    rows_p = _round_up(rows, tile)
    if rows_p != rows:
        x2 = jnp.pad(x2, ((0, rows_p - rows), (0, 0)))

    feats = pl.pallas_call(
        backbone_kernel,
        out_shape=jax.ShapeDtypeStruct((rows_p, d), jnp.float32),
        grid=(rows_p // tile,),
        in_specs=[
            pl.BlockSpec((tile, chw), lambda i: (i, 0)),
            pl.BlockSpec((chw, d), lambda i: (0, 0)),
            pl.BlockSpec((1, d), lambda i: (0, 0)),
        ],
        out_specs=pl.BlockSpec((tile, d), lambda i: (i, 0)),
        compiler_params=pltpu.CompilerParams(
            dimension_semantics=("parallel",),
            vmem_limit_bytes=32 * 1024 * 1024,
        ),
    )(x2, w_gap_bf16, b_bb)
    return feats[:rows]


# ---------------------------------------------------------------------------
# Fused head: bidirectional 2-layer GRU + Conv1d(k=1) combine + fc.
# ---------------------------------------------------------------------------
def _sigmoid(x):
    return 1.0 / (1.0 + jnp.exp(-x))


def rnn_head_kernel(feats_ref, h0_ref, w_ih_ref, w_hh_ref, b_ih_ref, b_hh_ref,
                    wconv_ref, wfc_ref, bfc_ref, o_ref):
    """feats_ref: (S, B, D) f32 time-major features.
    h0_ref:    (2*L, B, H)        initial hidden, index = 2*layer + direction
    w_ih_ref:  (2*L, 3, D, H)     input weights, gate order (r, z, n)
    w_hh_ref:  (2*L, 3, H, H)     hidden weights
    b_ih_ref / b_hh_ref: (2*L, 3, 1, H)
    wconv_ref: (S,) f32 in SMEM   Conv1d(S, 1, k=1, bias=False) weight
    wfc_ref:   (2*H, NC_PAD) f32  fc weight (zero-padded lanes)
    bfc_ref:   (1, NC_PAD) f32
    o_ref:     (B, NC_PAD) f32
    """
    n_frames, n_batch, d_in = feats_ref.shape
    hid = w_hh_ref.shape[-1]

    def mm(a, b):
        return jnp.dot(a, b, preferred_element_type=jnp.float32)

    def make_cell(ld, split_input=False):
        # Weights loaded once per (layer, direction); loops below are
        # trace-time unrolled so these loads are hoisted out of the time loop.
        w_i = [w_ih_ref[ld, g] for g in range(3)]
        w_h = [w_hh_ref[ld, g] for g in range(3)]
        b_i = [b_ih_ref[ld, g] for g in range(3)]
        b_h = [b_hh_ref[ld, g] for g in range(3)]

        if split_input:
            # Layer-1 input is cat([fwd, rev]); use split weight halves instead
            # of concatenating the activations (avoids lane relayout).
            # Valid because hidden = dim_feats // 2 and bidirectional => 2*H == D.
            w_i_f = [w[:hid] for w in w_i]
            w_i_r = [w[hid:] for w in w_i]

            def gates_i(x):
                x_f, x_r = x
                return [mm(x_f, w_i_f[g]) + mm(x_r, w_i_r[g]) + b_i[g]
                        for g in range(3)]
        else:
            def gates_i(x):
                return [mm(x, w_i[g]) + b_i[g] for g in range(3)]

        def cell(x, h):
            gi_r, gi_z, gi_n = gates_i(x)
            gh_r = mm(h, w_h[0]) + b_h[0]
            gh_z = mm(h, w_h[1]) + b_h[1]
            gh_n = mm(h, w_h[2]) + b_h[2]
            r = _sigmoid(gi_r + gh_r)
            z = _sigmoid(gi_z + gh_z)
            n = jnp.tanh(gi_n + r * gh_n)
            return (1.0 - z) * n + z * h

        return cell

    # ---- layer 0 (input = backbone feats); keep per-step outputs live ----
    cell = make_cell(0)
    h = h0_ref[0]
    l0_fwd = [None] * n_frames
    for t in range(n_frames):               # static unroll: S is small & fixed
        h = cell(feats_ref[t], h)
        l0_fwd[t] = h

    cell = make_cell(1)
    h = h0_ref[1]
    l0_rev = [None] * n_frames
    for s in range(n_frames):
        t = n_frames - 1 - s
        h = cell(feats_ref[t], h)
        l0_rev[t] = h

    # ---- layer 1; Conv1d(k=1) over frames == weighted sum over t, accumulated
    # directly inside the time loops (conv fused into the GRU epilogue) ----
    cell = make_cell(2, split_input=True)
    h = h0_ref[2]
    acc_f = jnp.zeros((n_batch, hid), jnp.float32)
    for t in range(n_frames):
        h = cell((l0_fwd[t], l0_rev[t]), h)
        acc_f = acc_f + wconv_ref[t] * h

    cell = make_cell(3, split_input=True)
    h = h0_ref[3]
    acc_r = jnp.zeros((n_batch, hid), jnp.float32)
    for s in range(n_frames):
        t = n_frames - 1 - s
        h = cell((l0_fwd[t], l0_rev[t]), h)
        acc_r = acc_r + wconv_ref[t] * h

    # ---- fc as two dots against static row slices of W_fc (no concat) ----
    # TODO(synk): nn.Dropout / final_dropout are inference no-ops; train-mode
    #             stochastic dropout is not applied.
    wfc = wfc_ref[...]
    out = (mm(acc_f, wfc[0:hid]) + mm(acc_r, wfc[hid:2 * hid]) + bfc_ref[...])
    o_ref[...] = out


def rnn_head_forward(x, params):
    """x: (B, S, C, H, W) f32 -> (B,) f32  (matches `self.fc(out)[:, 0]`)."""
    B, S, C, H, W = x.shape
    D = params["b_bb"].shape[1]

    # --- per-frame backbone, tiled & pipelined over the B*S row axis ---
    x2 = x.reshape(B * S, C * H * W)
    feats = run_backbone(x2, params["w_gap"], params["b_bb"])        # (B*S, D)
    # TODO(synk): self.dropout on backbone feats is an inference no-op.

    # Time-major (S, B, D) so each GRU step is a leading-axis slice; the
    # transpose is over the tiny feature tensor, not the image tensor.
    feats = feats.reshape(B, S, D).transpose(1, 0, 2)

    out = pl.pallas_call(
        rnn_head_kernel,
        out_shape=jax.ShapeDtypeStruct((B, NC_PAD), jnp.float32),
        in_specs=[
            pl.BlockSpec(memory_space=pltpu.MemorySpace.VMEM),   # feats
            pl.BlockSpec(memory_space=pltpu.MemorySpace.VMEM),   # h0
            pl.BlockSpec(memory_space=pltpu.MemorySpace.VMEM),   # w_ih
            pl.BlockSpec(memory_space=pltpu.MemorySpace.VMEM),   # w_hh
            pl.BlockSpec(memory_space=pltpu.MemorySpace.VMEM),   # b_ih
            pl.BlockSpec(memory_space=pltpu.MemorySpace.VMEM),   # b_hh
            pl.BlockSpec(memory_space=pltpu.MemorySpace.SMEM),   # w_conv
            pl.BlockSpec(memory_space=pltpu.MemorySpace.VMEM),   # w_fc (padded)
            pl.BlockSpec(memory_space=pltpu.MemorySpace.VMEM),   # b_fc (padded)
        ],
        out_specs=pl.BlockSpec(memory_space=pltpu.MemorySpace.VMEM),
    )(feats, params["h0"], params["w_ih"], params["w_hh"],
      params["b_ih"], params["b_hh"], params["w_conv"],
      params["w_fc_pad"], params["b_fc_pad"])

    # PyTorch: self.fc(out)[:, 0]  ->  (B,)
    return out[:, 0]


if __name__ == "__main__":
    key = jax.random.PRNGKey(0)
    (kx, kwb, kbb, kih, khh, kbi, kbh, kcv, kfc, kbf, kh0) = jax.random.split(key, 11)

    # Small shapes consistent with the module: S stacked frames (num_stack),
    # NCHW images, bidirectional 2-layer GRU with hidden = dim_feats // 2.
    B, S, C, H, W = 2, 8, 4, 16, 16
    D = 32                      # dim_feats of the synthetic backbone
    HID = D // 2                # hidden_size (bidirectional default)
    L = 2                       # num_layers
    NC = 2                      # num_classes

    x = jax.random.normal(kx, (B, S, C, H, W), jnp.float32)

    # Synthetic backbone (GAP + Linear + ReLU); GAP folded into the weight and
    # cast to bf16 for the MXU (f32 accumulation in-kernel).
    w_bb = 0.1 * jax.random.normal(kwb, (C, D), jnp.float32)
    w_gap = (jnp.repeat(w_bb, H * W, axis=0) / float(H * W)).astype(jnp.bfloat16)
    b_bb = 0.1 * jax.random.normal(kbb, (1, D), jnp.float32)

    # GRU parameters, gate order (r, z, n); leading index = 2*layer + direction.
    w_ih = 0.1 * jax.random.normal(kih, (2 * L, 3, D, HID), jnp.float32)
    w_hh = 0.1 * jax.random.normal(khh, (2 * L, 3, HID, HID), jnp.float32)
    b_ih = 0.1 * jax.random.normal(kbi, (2 * L, 3, 1, HID), jnp.float32)
    b_hh = 0.1 * jax.random.normal(kbh, (2 * L, 3, 1, HID), jnp.float32)

    # Conv1d(S, 1, kernel_size=1, bias=False) over the frame (channel) axis.
    w_conv = 0.1 * jax.random.normal(kcv, (S,), jnp.float32)

    # fc, zero-padded to a lane-dense 128-wide output inside the kernel.
    w_fc = 0.1 * jax.random.normal(kfc, (2 * HID, NC), jnp.float32)
    b_fc = 0.1 * jax.random.normal(kbf, (1, NC), jnp.float32)
    w_fc_pad = jnp.zeros((2 * HID, NC_PAD), jnp.float32).at[:, :NC].set(w_fc)
    b_fc_pad = jnp.zeros((1, NC_PAD), jnp.float32).at[:, :NC].set(b_fc)

    # TODO(synk): init_hidden() draws torch.randn each forward; here a
    #             deterministic draw from PRNGKey(0) is passed in explicitly.
    h0 = jax.random.normal(kh0, (2 * L, B, HID), jnp.float32)

    params = dict(w_gap=w_gap, b_bb=b_bb, w_ih=w_ih, w_hh=w_hh, b_ih=b_ih,
                  b_hh=b_hh, w_conv=w_conv, w_fc_pad=w_fc_pad,
                  b_fc_pad=b_fc_pad, h0=h0)

    out = rnn_head_forward(x, params)
    out = jax.block_until_ready(out)
    assert out.shape == (B,), out.shape
    assert out.dtype == jnp.float32
    assert bool(jnp.all(jnp.isfinite(out)))
    print("KERNEL_OK")
</pallas_src>

<mosaic_0001>
module attributes {stable_mosaic.version = 11 : i64} {
  func.func @backbone_kernel(%arg0: i32, %arg1: memref<16x1024xf32, #tpu.memory_space<vmem>>, %arg2: memref<1024x32xbf16, #tpu.memory_space<vmem>>, %arg3: memref<1x32xf32, #tpu.memory_space<vmem>>, %arg4: memref<16x32xf32, #tpu.memory_space<vmem>>) attributes {dimension_semantics = [#tpu.dimension_semantics<parallel>], iteration_bounds = array<i64: 1>, scalar_prefetch = 0 : i64, scratch_operands = 0 : i64, tpu.core_type = #tpu.core_type<tc>, window_params = [{transform_indices = @transform_0, window_bounds = array<i64: 16, 1024>}, {pipeline_mode = #tpu.pipeline_mode<synchronous>, transform_indices = @transform_1, window_bounds = array<i64: 1024, 32>}, {pipeline_mode = #tpu.pipeline_mode<synchronous>, transform_indices = @transform_2, window_bounds = array<i64: 1, 32>}, {transform_indices = @transform_3, window_bounds = array<i64: 16, 32>}]} {
    %c0 = arith.constant 0 : index
    %c0_0 = arith.constant 0 : index
    %0 = vector.load %arg1[%c0, %c0_0] : memref<16x1024xf32, #tpu.memory_space<vmem>>, vector<16x1024xf32>
    %1 = arith.truncf %0 : vector<16x1024xf32> to vector<16x1024xbf16>
    %c0_1 = arith.constant 0 : index
    %c0_2 = arith.constant 0 : index
    %2 = vector.load %arg2[%c0_1, %c0_2] : memref<1024x32xbf16, #tpu.memory_space<vmem>>, vector<1024x32xbf16>
    %cst = arith.constant dense<0.000000e+00> : vector<16x32xf32>
    %3 = tpu.matmul %1, %2, %cst {dimension_numbers = #tpu.dot_dimension_numbers<[1], [0], [0], [1], [0, 0, 1, 1], [], []>} : vector<16x1024xbf16>, vector<1024x32xbf16>, vector<16x32xf32> -> vector<16x32xf32>
    %c0_3 = arith.constant 0 : index
    %c0_4 = arith.constant 0 : index
    %4 = vector.load %arg3[%c0_3, %c0_4] : memref<1x32xf32, #tpu.memory_space<vmem>>, vector<1x32xf32>
    %5 = vector.broadcast %4 : vector<1x32xf32> to vector<16x32xf32>
    %6 = arith.addf %3, %5 : vector<16x32xf32>
    %cst_5 = arith.constant 0.000000e+00 : f32
    %7 = vector.broadcast %cst_5 : f32 to vector<16x32xf32>
    %8 = arith.maximumf %6, %7 : vector<16x32xf32>
    %c0_6 = arith.constant 0 : index
    %c0_7 = arith.constant 0 : index
    %9 = vector.load %arg4[%c0_6, %c0_7] : memref<16x32xf32, #tpu.memory_space<vmem>>, vector<16x32xf32>
    tpu.vector_store %arg4[%c0_6, %c0_7], %8 {strides = array<i32>} : memref<16x32xf32, #tpu.memory_space<vmem>>, vector<16x32xf32>,
    return
  }
  func.func @transform_0(%arg0: i32) -> (i32, i32) {
    %c0_i32 = arith.constant 0 : i32
    %c0_i32_0 = arith.constant 0 : i32
    return %arg0, %c0_i32 : i32, i32
  }
  func.func @transform_1(%arg0: i32) -> (i32, i32) {
    %c0_i32 = arith.constant 0 : i32
    %c0_i32_0 = arith.constant 0 : i32
    %c0_i32_1 = arith.constant 0 : i32
    return %c0_i32, %c0_i32_0 : i32, i32
  }
  func.func @transform_2(%arg0: i32) -> (i32, i32) {
    %c0_i32 = arith.constant 0 : i32
    %c0_i32_0 = arith.constant 0 : i32
    %c0_i32_1 = arith.constant 0 : i32
    return %c0_i32, %c0_i32_0 : i32, i32
  }
  func.func @transform_3(%arg0: i32) -> (i32, i32) {
    %c0_i32 = arith.constant 0 : i32
    %c0_i32_0 = arith.constant 0 : i32
    return %arg0, %c0_i32 : i32, i32
  }
}

</mosaic_0001>

<bundles_post_ra>
// kernel: tpu_custom_call.1
= control target key start
LH: loop header
LB: loop body
LE: loop exit
PB: predicated region body
PF: predicated region fallthrough
CT: control target
= control target key end

     0   :  { %s1266_s0 = inlined_call_operand.vmem [shape: f32[16,1024], index: 0, kind: input, shape index: {}]   ;;  %s1267_s1 = inlined_call_operand.vmem [shape: bf16[1024,32], index: 1, kind: input, shape index: {}]   ;;  %s1268_s2 = inlined_call_operand.vmem [shape: f32[1,32], index: 2, kind: input, shape index: {}]   ;;  %s1269_s3 = inlined_call_operand.hbm [shape: f32[16,32], index: 3, kind: output, shape index: {}]  }
   0x1   :  { %v900_v0 = vld [vmem:[%s1267_s1 + $0x40] sm:$0xff]   ;;  %v904_v4 = vld [vmem:[%s1267_s1 + $0x48] sm:$0xff]   ;;  %v908_v8 = vld [vmem:[%s1267_s1 + $0x50] sm:$0xff]  }
   0x2   :  { %v901_v1 = vld [vmem:[%s1267_s1 + $0xc0] sm:$0xff]   ;;  %809 = vmatprep.subr.bf16.mxu0 %v900_v0  ;;  %v905_v5 = vld [vmem:[%s1267_s1 + $0xc8] sm:$0xff]   ;;  %v909_v9 = vld [vmem:[%s1267_s1 + $0xd0] sm:$0xff]  }
   0x3   :  { %v902_v2 = vld [vmem:[%s1267_s1] sm:$0xff]   ;;  %831 = vmatprep.subr.bf16.mxu1 %v901_v1  ;;  %v906_v6 = vld [vmem:[%s1267_s1 + $0x8] sm:$0xff]   ;;  %v910_v10 = vld [vmem:[%s1267_s1 + $0x10] sm:$0xff]  }
   0x4   :  { %v903_v3 = vld [vmem:[%s1267_s1 + $0x80] sm:$0xff]   ;;  %810 = vmatpush3.bf16.msra.mxu0 %v902_v2  ;;  %v907_v7 = vld [vmem:[%s1267_s1 + $0x88] sm:$0xff]   ;;  %v911_v11 = vld [vmem:[%s1267_s1 + $0x90] sm:$0xff]  }
   0x5   :  { %832 = vmatpush3.bf16.msra.mxu1 %v903_v3  ;;  %811 = vmatprep.subr.bf16.mxu0 %v904_v4  ;;  %v912_v12 = vld [vmem:[%s1267_s1 + $0x58] sm:$0xff]   ;;  %v916_v16 = vld [vmem:[%s1267_s1 + $0x60] sm:$0xff]   ;;  %v920_v20 = vld [vmem:[%s1267_s1 + $0x68] sm:$0xff]  }
   0x6   :  { %833 = vmatprep.subr.bf16.mxu1 %v905_v5  ;;  %v913_v13 = vld [vmem:[%s1267_s1 + $0xd8] sm:$0xff]   ;;  %v917_v17 = vld [vmem:[%s1267_s1 + $0xe0] sm:$0xff]   ;;  %v921_v21 = vld [vmem:[%s1267_s1 + $0xe8] sm:$0xff]  }
   0x7   :  { %v914_v14 = vld [vmem:[%s1267_s1 + $0x18] sm:$0xff]   ;;  %v918_v18 = vld [vmem:[%s1267_s1 + $0x20] sm:$0xff]   ;;  %v922_v22 = vld [vmem:[%s1267_s1 + $0x28] sm:$0xff]  }
   0x8   :  { %812 = vmatpush3.bf16.msra.mxu0 %v906_v6  ;;  %v915_v15 = vld [vmem:[%s1267_s1 + $0x98] sm:$0xff]   ;;  %v919_v19 = vld [vmem:[%s1267_s1 + $0xa0] sm:$0xff]   ;;  %v923_v23 = vld [vmem:[%s1267_s1 + $0xa8] sm:$0xff]  }
   0x9   :  { %834 = vmatpush3.bf16.msra.mxu1 %v907_v7  ;;  %813 = vmatprep.subr.bf16.mxu0 %v908_v8  ;;  %v924_v24 = vld [vmem:[%s1267_s1 + $0x70] sm:$0xff]   ;;  %v928_v28 = vld [vmem:[%s1267_s1 + $0x78] sm:$0xff]   ;;  %v17_v32 = vld [vmem:[%s1266_s0 + $0x8] sm:$0xff] }
   0xa   :  { %835 = vmatprep.subr.bf16.mxu1 %v909_v9  ;;  %v925_v25 = vld [vmem:[%s1267_s1 + $0xf0] sm:$0xff]   ;;  %v929_v29 = vld [vmem:[%s1267_s1 + $0xf8] sm:$0xff]   ;;  %v25_v33 = vld [vmem:[%s1266_s0 + $0x48] sm:$0xff] }
   0xb   :  { %v926_v26 = vld [vmem:[%s1267_s1 + $0x30] sm:$0xff]   ;;  %v930_v30 = vld [vmem:[%s1267_s1 + $0x38] sm:$0xff]   ;;  %v33_v35 = vpack.c.bf16 %v25_v33, %v17_v32  ;;  %v16_v37 = vld [vmem:[%s1266_s0] sm:$0xff] }
   0xc   :  { %814 = vmatpush3.bf16.msra.mxu0 %v910_v10  ;;  %v927_v27 = vld [vmem:[%s1267_s1 + $0xb0] sm:$0xff]   ;;  %v931_v31 = vld [vmem:[%s1267_s1 + $0xb8] sm:$0xff]   ;;  %v24_v38 = vld [vmem:[%s1266_s0 + $0x40] sm:$0xff] }
   0xd   :  { %836 = vmatpush3.bf16.msra.mxu1 %v911_v11  ;;  %815 = vmatprep.subr.bf16.mxu0 %v912_v12  ;;  %v19_v34 = vld [vmem:[%s1266_s0 + $0x18] sm:$0xff]  ;;  %v32_v40 = vpack.c.bf16 %v24_v38, %v16_v37  ;;  %v18_v41 = vld [vmem:[%s1266_s0 + $0x10] sm:$0xff]  ;;  %v932_v44 = vld [vmem:[%s1267_s1 + $0x140] sm:$0xff]  }
   0xe   :  { %837 = vmatprep.subr.bf16.mxu1 %v913_v13  ;;  %v27_v36 = vld [vmem:[%s1266_s0 + $0x58] sm:$0xff]  ;;  %v26_v42 = vld [vmem:[%s1266_s0 + $0x50] sm:$0xff]  ;;  %591 = vmatprep.mubr.bf16.mxu0 %v33_v35  ;;  %v933_v45 = vld [vmem:[%s1267_s1 + $0x1c0] sm:$0xff]  }
   0xf   :  { %v35_v39 = vpack.c.bf16 %v27_v36, %v19_v34  ;;  %v34_v43 = vpack.c.bf16 %v26_v42, %v18_v41  ;;  %v934_v46 = vld [vmem:[%s1267_s1 + $0x100] sm:$0xff]   ;;  %v936_v48 = vld [vmem:[%s1267_s1 + $0x148] sm:$0xff]   ;;  %v940_v52 = vld [vmem:[%s1267_s1 + $0x150] sm:$0xff]  }
  0x10   :  { %816 = vmatpush3.bf16.msra.mxu0 %v914_v14  ;;  %v935_v47 = vld [vmem:[%s1267_s1 + $0x180] sm:$0xff]   ;;  %v937_v49 = vld [vmem:[%s1267_s1 + $0x1c8] sm:$0xff]   ;;  %v941_v53 = vld [vmem:[%s1267_s1 + $0x1d0] sm:$0xff]  }
  0x11   :  { %838 = vmatpush3.bf16.msra.mxu1 %v915_v15  ;;  %817 = vmatprep.subr.bf16.mxu0 %v916_v16  ;;  %v938_v50 = vld [vmem:[%s1267_s1 + $0x108] sm:$0xff]   ;;  %v942_v54 = vld [vmem:[%s1267_s1 + $0x110] sm:$0xff]   ;;  %v944_v56 = vld [vmem:[%s1267_s1 + $0x158] sm:$0xff]  }
  0x12   :  { %839 = vmatprep.subr.bf16.mxu1 %v917_v17  ;;  %632 = vmatprep.mubr.bf16.mxu1 %v35_v39  ;;  %v939_v51 = vld [vmem:[%s1267_s1 + $0x188] sm:$0xff]   ;;  %v943_v55 = vld [vmem:[%s1267_s1 + $0x190] sm:$0xff]   ;;  %v945_v57 = vld [vmem:[%s1267_s1 + $0x1d8] sm:$0xff]  }
  0x13   :  { %v946_v58 = vld [vmem:[%s1267_s1 + $0x118] sm:$0xff]   ;;  %v948_v60 = vld [vmem:[%s1267_s1 + $0x160] sm:$0xff]   ;;  %v952_v0 = vld [vmem:[%s1267_s1 + $0x168] sm:$0xff]  }
  0x14   :  { %818 = vmatpush3.bf16.msra.mxu0 %v918_v18  ;;  %v947_v59 = vld [vmem:[%s1267_s1 + $0x198] sm:$0xff]   ;;  %v949_v61 = vld [vmem:[%s1267_s1 + $0x1e0] sm:$0xff]   ;;  %v953_v1 = vld [vmem:[%s1267_s1 + $0x1e8] sm:$0xff]  }
  0x15   :  { %840 = vmatpush3.bf16.msra.mxu1 %v919_v19  ;;  %819 = vmatprep.subr.bf16.mxu0 %v920_v20  ;;  %v950_v62 = vld [vmem:[%s1267_s1 + $0x120] sm:$0xff]   ;;  %v954_v2 = vld [vmem:[%s1267_s1 + $0x128] sm:$0xff]   ;;  %v956_v4 = vld [vmem:[%s1267_s1 + $0x170] sm:$0xff]  }
  0x16   :  { %841 = vmatprep.subr.bf16.mxu1 %v921_v21  ;;  %v951_v63 = vld [vmem:[%s1267_s1 + $0x1a0] sm:$0xff]   ;;  %v955_v3 = vld [vmem:[%s1267_s1 + $0x1a8] sm:$0xff]   ;;  %v957_v5 = vld [vmem:[%s1267_s1 + $0x1f0] sm:$0xff]  }
  0x17   :  { %v958_v6 = vld [vmem:[%s1267_s1 + $0x130] sm:$0xff]   ;;  %v960_v8 = vld [vmem:[%s1267_s1 + $0x178] sm:$0xff]   ;;  %v21_v12 = vld [vmem:[%s1266_s0 + $0x28] sm:$0xff] }
  0x18   :  { %820 = vmatpush3.bf16.msra.mxu0 %v922_v22  ;;  %v959_v7 = vld [vmem:[%s1267_s1 + $0x1b0] sm:$0xff]   ;;  %v961_v9 = vld [vmem:[%s1267_s1 + $0x1f8] sm:$0xff]   ;;  %v29_v13 = vld [vmem:[%s1266_s0 + $0x68] sm:$0xff] }
  0x19   :  { %842 = vmatpush3.bf16.msra.mxu1 %v923_v23  ;;  %821 = vmatprep.subr.bf16.mxu0 %v924_v24  ;;  %v962_v10 = vld [vmem:[%s1267_s1 + $0x138] sm:$0xff]   ;;  %v37_v16 = vpack.c.bf16 %v29_v13, %v21_v12  ;;  %v20_v18 = vld [vmem:[%s1266_s0 + $0x20] sm:$0xff]  ;;  %v22_v20 = vld [vmem:[%s1266_s0 + $0x30] sm:$0xff] }
  0x1a   :  { %843 = vmatprep.subr.bf16.mxu1 %v925_v25  ;;  %v963_v11 = vld [vmem:[%s1267_s1 + $0x1b8] sm:$0xff]   ;;  %v28_v19 = vld [vmem:[%s1266_s0 + $0x60] sm:$0xff]  ;;  %v30_v22 = vld [vmem:[%s1266_s0 + $0x70] sm:$0xff] }
  0x1b   :  { %v23_v14 = vld [vmem:[%s1266_s0 + $0x38] sm:$0xff]  ;;  %v36_v21 = vpack.c.bf16 %v28_v19, %v20_v18 }
  0x1c   :  { %822 = vmatpush3.bf16.msra.mxu0 %v926_v26  ;;  %v31_v15 = vld [vmem:[%s1266_s0 + $0x78] sm:$0xff] }
  0x1d   :  { %844 = vmatpush3.bf16.msra.mxu1 %v927_v27  ;;  %823 = vmatprep.subr.bf16.mxu0 %v928_v28  ;;  %v39_v17 = vpack.c.bf16 %v31_v15, %v23_v14 }
  0x1e   :  { %845 = vmatprep.subr.bf16.mxu1 %v929_v29 }
  0x20   :  { %824 = vmatpush3.bf16.msra.mxu0 %v930_v30 }
  0x21   :  { %846 = vmatpush3.bf16.msra.mxu1 %v931_v31  ;;  %853 = vmatprep.subr.bf16.mxu0 %v932_v44 }
  0x22   :  { %875 = vmatprep.subr.bf16.mxu1 %v933_v45 }
  0x23   :  { %592 = vmatmul.mubr.bf16.vlgmr.msra.gmra.mrb[0].mxu0 %v32_v40 }
  0x24   :  { %633 = vmatmul.mubr.bf16.vlgmr.msra.gmra.mrb[0].mxu1 %v34_v43  ;;  %854 = vmatpush3.bf16.msra.mxu0 %v934_v46 }
  0x25   :  { %876 = vmatpush3.bf16.msra.mxu1 %v935_v47  ;;  %855 = vmatprep.subr.bf16.mxu0 %v936_v48 }
  0x26   :  { %877 = vmatprep.subr.bf16.mxu1 %v937_v49 }
  0x28   :  { %856 = vmatpush3.bf16.msra.mxu0 %v938_v50 }
  0x29   :  { %878 = vmatpush3.bf16.msra.mxu1 %v939_v51  ;;  %857 = vmatprep.subr.bf16.mxu0 %v940_v52 }
  0x2a   :  { %879 = vmatprep.subr.bf16.mxu1 %v941_v53 }
  0x2c   :  { %858 = vmatpush3.bf16.msra.mxu0 %v942_v54 }
  0x2d   :  { %880 = vmatpush3.bf16.msra.mxu1 %v943_v55  ;;  %859 = vmatprep.subr.bf16.mxu0 %v944_v56 }
  0x2e   :  { %881 = vmatprep.subr.bf16.mxu1 %v945_v57 }
  0x30   :  { %860 = vmatpush3.bf16.msra.mxu0 %v946_v58 }
  0x31   :  { %882 = vmatpush3.bf16.msra.mxu1 %v947_v59  ;;  %861 = vmatprep.subr.bf16.mxu0 %v948_v60 }
  0x32   :  { %883 = vmatprep.subr.bf16.mxu1 %v949_v61 }
  0x34   :  { %862 = vmatpush3.bf16.msra.mxu0 %v950_v62 }
  0x35   :  { %884 = vmatpush3.bf16.msra.mxu1 %v951_v63  ;;  %863 = vmatprep.subr.bf16.mxu0 %v952_v0 }
  0x36   :  { %885 = vmatprep.subr.bf16.mxu1 %v953_v1 }
  0x38   :  { %864 = vmatpush3.bf16.msra.mxu0 %v954_v2 }
  0x39   :  { %886 = vmatpush3.bf16.msra.mxu1 %v955_v3  ;;  %865 = vmatprep.subr.bf16.mxu0 %v956_v4 }
  0x3a   :  { %887 = vmatprep.subr.bf16.mxu1 %v957_v5 }
  0x3c   :  { %866 = vmatpush3.bf16.msra.mxu0 %v958_v6 }
  0x3d   :  { %888 = vmatpush3.bf16.msra.mxu1 %v959_v7  ;;  %867 = vmatprep.subr.bf16.mxu0 %v960_v8 }
  0x3e   :  { %889 = vmatprep.subr.bf16.mxu1 %v961_v9 }
  0x40   :  { %868 = vmatpush3.bf16.msra.mxu0 %v962_v10 }
  0x41   :  { %890 = vmatpush3.bf16.msra.mxu1 %v963_v11 }
  0x42   :  { %8 = vsyncpa [#allocation3], 0  ;;  %673 = vmatprep.mubr.bf16.mxu0 %v37_v16  ;;  %714 = vmatprep.mubr.bf16.mxu1 %v39_v17  ;;  %v38_v23 = vpack.c.bf16 %v30_v22, %v22_v20  ;;  %v744_v26 = vld [vmem:[%s1268_s2] ss:$0 sm:$0xff]  ;;  %vm725_vm0 = vcmask 261120   ;;  %s988_s0 = smov [#allocation2]  }
  0x43   :  { %674 = vmatmul.mubr.bf16.vlgmr.msra.gmra.mrb[4].mxu0 %v36_v21  ;;  %s733_s2 = sshll.u32 %s988_s0, 4  ;;  %s734_s2 = int_to_ptr.vmem [resolvable:$true] %s733_s2 }
  0x44   :  { %715 = vmatmul.mubr.bf16.vlgmr.msra.gmra.mrb[4].mxu1 %v38_v23  ;;  %s964_s11 = scalar_lea.vmem %s734_s2, 256  ;;  %p969_p1 = scmp.lt.s32.totalorder %s734_s2, %s734_s2 }
  0x45   :  { %p965_p0 = scmp.ne.s32.totalorder %s734_s2, %s964_s11  ;;  %p970_p2 = scmp.lt.s32.totalorder %s964_s11, %s964_s11 }
  0x47   :  { %p971_p3 = por %p970_p2, %p969_p1 }
  0x49   :  { %p972_p4 = pnand %p971_p3, %p965_p0 }
  0xf6   :  { %v825_v24 = vpop.f32.mrb[0].mxu0 }
  0xf7   :  { %v847_v25 = vpop.f32.mrb[0].mxu1  ;;  %v826_v27 = vpop.f32.mrb[1].mxu0 }
  0xf8   :  { %v827_v28 = vadd.f32 %v826_v27, %v825_v24  ;;  %v848_v29 = vpop.f32.mrb[1].mxu1  ;;  %v828_v30 = vpop.f32.mrb[2].mxu0 }
  0xf9   :  { %v849_v31 = vadd.f32 %v848_v29, %v847_v25  ;;  %v850_v32 = vpop.f32.mrb[2].mxu1  ;;  %v829_v33 = vpop.f32.mrb[3].mxu0 }
  0xfa   :  { %v594_v34 = vadd.f32 %v827_v28, %v744_v26  ;;  %v830_v35 = vadd.f32 %v829_v33, %v828_v30  ;;  %v851_v36 = vpop.f32.mrb[3].mxu1 }
  0xfb   :  { %v852_v37 = vadd.f32 %v851_v36, %v850_v32 }
  0xfc   :  { %v635_v38 = vadd.f32 %v849_v31, %v594_v34  ;;  %v597_v39 = vadd.f32 %v830_v35, %v744_v26 }
  0xfe   :  { %v638_v40 = vadd.f32 %v852_v37, %v597_v39 }
 0x116   :  { %v869_v41 = vpop.f32.mrb[4].mxu0 }
 0x117   :  { %v891_v42 = vpop.f32.mrb[4].mxu1  ;;  %v870_v43 = vpop.f32.mrb[5].mxu0 }
 0x118   :  { %v871_v44 = vadd.f32 %v870_v43, %v869_v41  ;;  %v892_v45 = vpop.f32.mrb[5].mxu1  ;;  %v872_v46 = vpop.f32.mrb[6].mxu0 }
 0x119   :  { %v893_v47 = vadd.f32 %v892_v45, %v891_v42  ;;  %v894_v48 = vpop.f32.mrb[6].mxu1  ;;  %v873_v49 = vpop.f32.mrb[7].mxu0 }
 0x11a   :  { %v676_v50 = vadd.f32 %v871_v44, %v635_v38  ;;  %v874_v51 = vadd.f32 %v873_v49, %v872_v46  ;;  %v895_v52 = vpop.f32.mrb[7].mxu1 }
 0x11b   :  { %v896_v53 = vadd.f32 %v895_v52, %v894_v48 }
 0x11c   :  { %v717_v54 = vadd.f32 %v893_v47, %v676_v50  ;;  %v679_v55 = vadd.f32 %v874_v51, %v638_v40 }
 0x11e   :  { %v723_v56 = vmax.f32 %v717_v54, 0.0  ;;  %v720_v57 = vadd.f32 %v896_v53, %v679_v55 }
 0x120   :  { %726 = vst.msk [vmem:[#allocation2] sm:$0xff] %vm725_vm0, %v723_v56  ;;  %v724_v58 = vmax.f32 %v720_v57, 0.0 }
 0x122   :  { %727 = vst.msk [vmem:[#allocation2 + $0x8] sm:$0xff] %vm725_vm0, %v724_v58 }
 0x123   :  { %975 = shalt.err (!%p972_p4)
}
 0x124   :  { %s976_s14 = scalar_lea.hbm %s1269_s3, 256 }
 0x125   :  { %p977_p5 = scmp.ne.s32.totalorder %s1269_s3, %s976_s14  ;;  %p980_p6 = scmp.lt.u32.totalorder %s976_s14, %s1269_s3 }
 0x127   :  { %p982_p7 = pnand %p980_p6, %p977_p5 }
 0x129   :  { %985 = shalt.err (!%p982_p7)
}
 0x12a   :  { %s989_s19 = smov 128   ;;  %s990_s20 = smov 8  }
 0x12b   :  { %739 = dma.vmem_to_hbm [thread:$0]  %s734_s2, 256, %s1269_s3, [#allocation3], %s989_s19, %s989_s19, %s990_s20  }
 0x12c   :  { %986 = dma.done.wait [#allocation3], 256  }
 0x12d   :  { %987 = vsyncadd [#allocation3], 4294967040 }
 0x12e   :  { %743 = vsyncpa [#allocation3], 1 }

</bundles_post_ra>
